<compile_context>
chip_gen: v7x
topology: tpu7x:2x2x1
jax: 0.10.0
libtpu: 0.0.40
codegen_flags: <defaults>
</compile_context>

<pallas_src>
import functools

import jax
import jax.numpy as jnp
from jax import lax
from jax.experimental import pallas as pl
from jax.experimental.pallas import tpu as pltpu

BN_EPS = 1e-5
VMEM_LIMIT = 32 * 1024 * 1024   # scoped-VMEM request; safe on v5e/v6e (128 MiB) and v7x (64 MiB)


def _mxu_f32_dot(a, b):
    """f32-accurate matmul on the MXU.

    Splits each f32 operand into bf16 hi/lo parts and accumulates three bf16 matmuls in
    f32 (representation error ~2^-18 relative), so the contraction runs on the MXU's
    extended slot on every TPU generation (v5e/v6e/v7x all take bf16 natively) while
    keeping f32-grade accuracy independent of the backend's default f32-matmul precision.
    """
    dot = functools.partial(jnp.dot, preferred_element_type=jnp.float32)
    a_hi = a.astype(jnp.bfloat16)
    a_lo = (a - a_hi.astype(jnp.float32)).astype(jnp.bfloat16)
    b_hi = b.astype(jnp.bfloat16)
    b_lo = (b - b_hi.astype(jnp.float32)).astype(jnp.bfloat16)
    return dot(a_hi, b_hi) + dot(a_hi, b_lo) + dot(a_lo, b_hi)


def _partial_stats(y, mask, count):
    """Per-image (sum, SSD about the per-image mean) per channel, as one lane-dense slab.

    Lanes [0:128] broadcast the per-channel sum, lanes [128:256] the per-channel SSD, so
    the stats leave the kernel as a single unmasked 256-lane store instead of several
    (C, 1) masked stores.
    """
    s = jnp.sum(y * mask, axis=1, keepdims=True)
    mu = s * (1.0 / count)
    ssd = jnp.sum(mask * (y - mu) ** 2, axis=1, keepdims=True)
    c = y.shape[0]
    return jnp.concatenate(
        [jnp.broadcast_to(s, (c, 128)), jnp.broadcast_to(ssd, (c, 128))], axis=1)


def _combine_stats(stats, count):
    """Chan's parallel-variance combine of per-image partials -> global (mean, biased var)."""
    sums = stats[:, :, 0]        # (N, C) per-image channel sums
    ssds = stats[:, :, 128]      # (N, C) per-image SSDs about the per-image mean
    total = float(stats.shape[0]) * count
    mean = jnp.sum(sums, axis=0) / total
    between = jnp.sum((sums / count - mean[None, :]) ** 2, axis=0) * count
    var = (jnp.sum(ssds, axis=0) + between) / total
    return mean, var


@jax.jit
def residual_block_forward(x_nchw, params):
    w1, b1, g1, be1, w2, b2, g2, be2 = params
    # See GUARD note at the top: these cancel exactly through the next BatchNorm's mean
    # subtraction in this training-mode forward and are dropped from the kernel path.
    del b1, b2, be1

    N, C, H, W = x_nchw.shape
    Cmid = w1.shape[0]
    Cpad = ((Cmid + 7) // 8) * 8               # round mid channels up to a sublane tile
    Hp, Wp = H + 2, W + 2
    HWp = Hp * Wp                              # conv1 output pixels / image (all enter BN1)
    LZ = H * Wp                                # conv2 output lanes on the padded-grid layout
    PY = pl.cdiv(HWp, 128) * 128               # per-image lane length of the y1 slab

    # --- VMEM guard for the whole-image-resident conv2 step (the dominant consumer). ---
    # TODO(synk): switch kernel B to lane tiles with a 2*Wp halo once Cpad*PY grows past VMEM
    # (matters first on v7x's 64 MiB physical VMEM).
    conv2_step_bytes = 4 * (2 * Cpad * PY                 # double-buffered y1 block
                            + 2 * (C * LZ + C * 256)      # double-buffered outputs
                            + 9 * Cpad * LZ               # stacked window slab
                            + C * 9 * Cpad + Cpad)        # weights + BN1 scale
    if conv2_step_bytes > VMEM_LIMIT:
        raise ValueError(
            f"conv2 whole-image block needs ~{conv2_step_bytes} B of VMEM; re-tile kernel B.")

    x = x_nchw.astype(jnp.float32)
    # Channels already on sublanes: pad spatially, flatten the padded grid onto lanes,
    # zero-pad lanes to a 128 multiple (zero lanes are masked out of the BN statistics).
    x_pf = jnp.pad(jnp.pad(x, ((0, 0), (0, 0), (1, 1), (1, 1))).reshape(N, C, HWp),
                   ((0, 0), (0, 0), (0, PY - HWp)))
    # Residual pre-shifted to the conv2 output lane layout (j >= W lanes are don't-care),
    # so kernel C sees an already-aligned (1, C, LZ) block: no in-kernel lane rotate,
    # no over-fetched lanes.
    x_res = jnp.pad(x, ((0, 0), (0, 0), (0, 0), (0, Wp - W))).reshape(N, C, LZ)
    # conv1 weights, zero-padded to Cpad rows (dead rows cost nothing: 4 sublanes already
    # round up to an 8-sublane tile) so every sublane offset downstream is tile-aligned.
    w1p = jnp.pad(w1[:, :, 0, 0], ((0, Cpad - Cmid), (0, 0)))               # (Cpad, C)
    # conv2 weights pre-reshaped at trace time (independent of BN1 stats): tap-major rows,
    # zero columns for the padded mid channels.
    w2p = jnp.pad(jnp.transpose(w2, (0, 2, 3, 1)),
                  ((0, 0), (0, 0), (0, 0), (0, Cpad - Cmid))).reshape(C, 9 * Cpad)

    # ------------- Kernel A: 1x1 conv (whole image per step) + BN1 partial stats -------------
    def conv1_kernel(x_ref, w_ref, y_ref, st_ref):
        y = _mxu_f32_dot(w_ref[...], x_ref[0])                      # (Cpad, PY) on the MXU
        y_ref[0] = y
        lane = lax.broadcasted_iota(jnp.int32, (1, PY), 1)
        mask = (lane < HWp).astype(jnp.float32)                     # exclude the zero-pad tail
        st_ref[0] = _partial_stats(y, mask, HWp)

    y1, st1 = pl.pallas_call(
        conv1_kernel,
        grid=(N,),
        in_specs=[
            pl.BlockSpec((1, C, PY), lambda n: (n, 0, 0)),
            pl.BlockSpec((Cpad, C), lambda n: (0, 0)),
        ],
        out_specs=[
            pl.BlockSpec((1, Cpad, PY), lambda n: (n, 0, 0)),
            pl.BlockSpec((1, Cpad, 256), lambda n: (n, 0, 0)),
        ],
        out_shape=[
            # TODO(synk): store y1 in bf16 (BN stats stay f32) to halve this traffic on
            # v6e/v7x once the accuracy budget allows; kept f32 to hold the 2e-4 tolerance.
            jax.ShapeDtypeStruct((N, Cpad, PY), jnp.float32),
            jax.ShapeDtypeStruct((N, Cpad, 256), jnp.float32),
        ],
        compiler_params=pltpu.CompilerParams(
            dimension_semantics=("parallel",), vmem_limit_bytes=VMEM_LIMIT),
    )(x_pf, w1p)

    # BN1 global stats over all N*Hp*Wp conv1 pixels; only the per-channel scale survives.
    _, v1 = _combine_stats(st1, float(HWp))
    s1 = jnp.pad(g1 * lax.rsqrt(v1[:Cmid] + BN_EPS), (0, Cpad - Cmid)).reshape(Cpad, 1)

    # ------------- Kernel B: 3x3 conv as one MXU matmul over the stacked windows -------------
    def conv2_kernel(y_ref, w_ref, s1_ref, z_ref, st_ref):
        ys = y_ref[0] * s1_ref[...]                                 # BN1 scale applied in-kernel
        windows = []
        for t in range(9):                                          # stack the 9 taps ONCE
            shift = (t // 3) * Wp + (t % 3)
            windows.append(ys[:, shift:shift + LZ])                 # (Cpad, LZ), tile-aligned rows
        win = jnp.concatenate(windows, axis=0)                      # (9*Cpad, LZ)
        z = _mxu_f32_dot(w_ref[...], win)                           # (C, LZ) single MXU contraction
        z_ref[0] = z
        lane = lax.broadcasted_iota(jnp.int32, (1, LZ), 1)
        mask = ((lane % Wp) < W).astype(jnp.float32)                # in-kernel valid-column mask
        st_ref[0] = _partial_stats(z, mask, H * W)

    z_pre, st2 = pl.pallas_call(
        conv2_kernel,
        grid=(N,),
        in_specs=[
            pl.BlockSpec((1, Cpad, PY), lambda n: (n, 0, 0)),
            pl.BlockSpec((C, 9 * Cpad), lambda n: (0, 0)),
            pl.BlockSpec((Cpad, 1), lambda n: (0, 0)),
        ],
        out_specs=[
            pl.BlockSpec((1, C, LZ), lambda n: (n, 0, 0)),
            pl.BlockSpec((1, C, 256), lambda n: (n, 0, 0)),
        ],
        out_shape=[
            jax.ShapeDtypeStruct((N, C, LZ), jnp.float32),
            jax.ShapeDtypeStruct((N, C, 256), jnp.float32),
        ],
        compiler_params=pltpu.CompilerParams(
            dimension_semantics=("parallel",), vmem_limit_bytes=VMEM_LIMIT),
    )(y1, w2p, s1)

    # BN2 affine from global stats over the N*H*W valid conv2 outputs.
    m2, v2 = _combine_stats(st2, float(H * W))
    r2 = g2 * lax.rsqrt(v2 + BN_EPS)
    a2 = r2.reshape(C, 1)
    c2 = (be2 - m2 * r2).reshape(C, 1)

    # ------------- Kernel C: BN2 affine + residual + ReLU (pure FMA + max) -------------------
    def finish_kernel(z_ref, x_ref, a_ref, c_ref, o_ref):
        o_ref[0] = jnp.maximum(z_ref[0] * a_ref[...] + c_ref[...] + x_ref[0], 0.0)

    out_l = pl.pallas_call(
        finish_kernel,
        grid=(N,),
        in_specs=[
            pl.BlockSpec((1, C, LZ), lambda n: (n, 0, 0)),
            pl.BlockSpec((1, C, LZ), lambda n: (n, 0, 0)),
            pl.BlockSpec((C, 1), lambda n: (0, 0)),
            pl.BlockSpec((C, 1), lambda n: (0, 0)),
        ],
        out_specs=pl.BlockSpec((1, C, LZ), lambda n: (n, 0, 0)),
        out_shape=jax.ShapeDtypeStruct((N, C, LZ), jnp.float32),
        compiler_params=pltpu.CompilerParams(
            dimension_semantics=("parallel",), vmem_limit_bytes=VMEM_LIMIT),
    )(z_pre, x_res, a2, c2)

    # Output is already in NCHW channel/lane layout with H*Wp lanes per image (no XLA pad
    # needed anymore): layout-only reshape, then drop the 2 pad columns per row.
    return out_l.reshape(N, C, H, Wp)[:, :, :, :W]


def _reference_forward(x_nchw, params):
    """Pure-JAX (XLA) reference replicating the PyTorch forward (training-mode BN)."""
    w1, b1, g1, be1, w2, b2, g2, be2 = params

    def bn(y, g, b):
        mean = y.mean(axis=(0, 2, 3), keepdims=True)
        var = ((y - mean) ** 2).mean(axis=(0, 2, 3), keepdims=True)
        return ((y - mean) / jnp.sqrt(var + BN_EPS)) * g[None, :, None, None] \
            + b[None, :, None, None]

    y = lax.conv_general_dilated(
        x_nchw, w1, (1, 1), ((1, 1), (1, 1)),
        dimension_numbers=("NCHW", "OIHW", "NCHW"),
        precision=lax.Precision.HIGHEST)
    y = y + b1[None, :, None, None]
    y = bn(y, g1, be1)
    z = lax.conv_general_dilated(
        y, w2, (1, 1), ((0, 0), (0, 0)),
        dimension_numbers=("NCHW", "OIHW", "NCHW"),
        precision=lax.Precision.HIGHEST)
    z = z + b2[None, :, None, None]
    z = bn(z, g2, be2)
    return jnp.maximum(z + x_nchw, 0.0)


if __name__ == "__main__":
    N, C, H, W = 2, 8, 16, 16          # in_planes = 8 -> mid channels = 4
    Cmid = C // 2

    key = jax.random.PRNGKey(0)
    k_x, k_w1, k_b1, k_w2, k_b2 = jax.random.split(key, 5)

    x = jax.random.normal(k_x, (N, C, H, W), jnp.float32)

    w1 = jax.random.normal(k_w1, (Cmid, C, 1, 1), jnp.float32) * 0.2
    b1 = jax.random.normal(k_b1, (Cmid,), jnp.float32) * 0.1
    g1 = jnp.ones((Cmid,), jnp.float32)      # BatchNorm default init
    be1 = jnp.zeros((Cmid,), jnp.float32)

    w2 = jax.random.normal(k_w2, (C, Cmid, 3, 3), jnp.float32) * 0.2
    b2 = jax.random.normal(k_b2, (C,), jnp.float32) * 0.1
    g2 = jnp.ones((C,), jnp.float32)
    be2 = jnp.zeros((C,), jnp.float32)

    params = (w1, b1, g1, be1, w2, b2, g2, be2)

    out = jax.block_until_ready(residual_block_forward(x, params))
    ref = jax.block_until_ready(_reference_forward(x, params))

    assert out.shape == (N, C, H, W), out.shape
    assert jnp.allclose(out, ref, atol=2e-4, rtol=2e-4), \
        float(jnp.max(jnp.abs(out - ref)))

    print("KERNEL_OK")
</pallas_src>

<mosaic_0001>
module attributes {stable_mosaic.version = 11 : i64} {
  func.func @finish_kernel(%arg0: i32, %arg1: memref<1x8x288xf32, #tpu.memory_space<vmem>>, %arg2: memref<1x8x288xf32, #tpu.memory_space<vmem>>, %arg3: memref<8x1xf32, #tpu.memory_space<vmem>>, %arg4: memref<8x1xf32, #tpu.memory_space<vmem>>, %arg5: memref<1x8x288xf32, #tpu.memory_space<vmem>>) attributes {dimension_semantics = [#tpu.dimension_semantics<parallel>], iteration_bounds = array<i64: 2>, scalar_prefetch = 0 : i64, scratch_operands = 0 : i64, tpu.core_type = #tpu.core_type<tc>, window_params = [{transform_indices = @transform_0, window_bounds = array<i64: 1, 8, 288>}, {transform_indices = @transform_1, window_bounds = array<i64: 1, 8, 288>}, {pipeline_mode = #tpu.pipeline_mode<synchronous>, transform_indices = @transform_2, window_bounds = array<i64: 8, 1>}, {pipeline_mode = #tpu.pipeline_mode<synchronous>, transform_indices = @transform_3, window_bounds = array<i64: 8, 1>}, {transform_indices = @transform_4, window_bounds = array<i64: 1, 8, 288>}]} {
    %c0 = arith.constant 0 : index
    %c0_0 = arith.constant 0 : index
    %c0_1 = arith.constant 0 : index
    %0 = vector.load %arg1[%c0, %c0_0, %c0_1] : memref<1x8x288xf32, #tpu.memory_space<vmem>>, vector<1x8x288xf32>
    %1 = vector.shape_cast %0 : vector<1x8x288xf32> to vector<8x288xf32>
    %c0_2 = arith.constant 0 : index
    %c0_3 = arith.constant 0 : index
    %2 = vector.load %arg3[%c0_2, %c0_3] : memref<8x1xf32, #tpu.memory_space<vmem>>, vector<8x1xf32>
    %3 = vector.broadcast %2 : vector<8x1xf32> to vector<8x288xf32>
    %4 = arith.mulf %1, %3 : vector<8x288xf32>
    %c0_4 = arith.constant 0 : index
    %c0_5 = arith.constant 0 : index
    %5 = vector.load %arg4[%c0_4, %c0_5] : memref<8x1xf32, #tpu.memory_space<vmem>>, vector<8x1xf32>
    %6 = vector.broadcast %5 : vector<8x1xf32> to vector<8x288xf32>
    %7 = arith.addf %4, %6 : vector<8x288xf32>
    %c0_6 = arith.constant 0 : index
    %c0_7 = arith.constant 0 : index
    %c0_8 = arith.constant 0 : index
    %8 = vector.load %arg2[%c0_6, %c0_7, %c0_8] : memref<1x8x288xf32, #tpu.memory_space<vmem>>, vector<1x8x288xf32>
    %9 = vector.shape_cast %8 : vector<1x8x288xf32> to vector<8x288xf32>
    %10 = arith.addf %7, %9 : vector<8x288xf32>
    %cst = arith.constant 0.000000e+00 : f32
    %11 = vector.broadcast %cst : f32 to vector<8x288xf32>
    %12 = arith.maximumf %10, %11 : vector<8x288xf32>
    %c0_9 = arith.constant 0 : index
    %c0_10 = arith.constant 0 : index
    %c0_11 = arith.constant 0 : index
    %13 = vector.load %arg5[%c0_9, %c0_10, %c0_11] : memref<1x8x288xf32, #tpu.memory_space<vmem>>, vector<1x8x288xf32>
    %14 = vector.shape_cast %13 : vector<1x8x288xf32> to vector<8x288xf32>
    %15 = vector.shape_cast %12 : vector<8x288xf32> to vector<1x8x288xf32>
    tpu.vector_store %arg5[%c0_9, %c0_10, %c0_11], %15 {strides = array<i32>} : memref<1x8x288xf32, #tpu.memory_space<vmem>>, vector<1x8x288xf32>,
    return
  }
  func.func @transform_0(%arg0: i32) -> (i32, i32, i32) {
    %c0_i32 = arith.constant 0 : i32
    %c0_i32_0 = arith.constant 0 : i32
    %c0_i32_1 = arith.constant 0 : i32
    return %arg0, %c0_i32, %c0_i32_0 : i32, i32, i32
  }
  func.func @transform_1(%arg0: i32) -> (i32, i32, i32) {
    %c0_i32 = arith.constant 0 : i32
    %c0_i32_0 = arith.constant 0 : i32
    %c0_i32_1 = arith.constant 0 : i32
    return %arg0, %c0_i32, %c0_i32_0 : i32, i32, i32
  }
  func.func @transform_2(%arg0: i32) -> (i32, i32) {
    %c0_i32 = arith.constant 0 : i32
    %c0_i32_0 = arith.constant 0 : i32
    %c0_i32_1 = arith.constant 0 : i32
    return %c0_i32, %c0_i32_0 : i32, i32
  }
  func.func @transform_3(%arg0: i32) -> (i32, i32) {
    %c0_i32 = arith.constant 0 : i32
    %c0_i32_0 = arith.constant 0 : i32
    %c0_i32_1 = arith.constant 0 : i32
    return %c0_i32, %c0_i32_0 : i32, i32
  }
  func.func @transform_4(%arg0: i32) -> (i32, i32, i32) {
    %c0_i32 = arith.constant 0 : i32
    %c0_i32_0 = arith.constant 0 : i32
    %c0_i32_1 = arith.constant 0 : i32
    return %arg0, %c0_i32, %c0_i32_0 : i32, i32, i32
  }
}

module attributes {stable_mosaic.version = 11 : i64} {
  func.func @conv1_kernel(%arg0: i32, %arg1: memref<1x8x384xf32, #tpu.memory_space<vmem>>, %arg2: memref<8x8xf32, #tpu.memory_space<vmem>>, %arg3: memref<1x8x384xf32, #tpu.memory_space<vmem>>, %arg4: memref<1x8x256xf32, #tpu.memory_space<vmem>>) attributes {dimension_semantics = [#tpu.dimension_semantics<parallel>], iteration_bounds = array<i64: 2>, scalar_prefetch = 0 : i64, scratch_operands = 0 : i64, tpu.core_type = #tpu.core_type<tc>, window_params = [{transform_indices = @transform_0, window_bounds = array<i64: 1, 8, 384>}, {pipeline_mode = #tpu.pipeline_mode<synchronous>, transform_indices = @transform_1, window_bounds = array<i64: 8, 8>}, {transform_indices = @transform_2, window_bounds = array<i64: 1, 8, 384>}, {transform_indices = @transform_3, window_bounds = array<i64: 1, 8, 256>}]} {
    %c0 = arith.constant 0 : index
    %c0_0 = arith.constant 0 : index
    %0 = vector.load %arg2[%c0, %c0_0] : memref<8x8xf32, #tpu.memory_space<vmem>>, vector<8x8xf32>
    %c0_1 = arith.constant 0 : index
    %c0_2 = arith.constant 0 : index
    %c0_3 = arith.constant 0 : index
    %1 = vector.load %arg1[%c0_1, %c0_2, %c0_3] : memref<1x8x384xf32, #tpu.memory_space<vmem>>, vector<1x8x384xf32>
    %2 = vector.shape_cast %1 : vector<1x8x384xf32> to vector<8x384xf32>
    %3 = arith.truncf %0 : vector<8x8xf32> to vector<8x8xbf16>
    %4 = arith.extf %3 : vector<8x8xbf16> to vector<8x8xf32>
    %5 = arith.subf %0, %4 : vector<8x8xf32>
    %6 = arith.truncf %5 : vector<8x8xf32> to vector<8x8xbf16>
    %7 = arith.truncf %2 : vector<8x384xf32> to vector<8x384xbf16>
    %8 = arith.extf %7 : vector<8x384xbf16> to vector<8x384xf32>
    %9 = arith.subf %2, %8 : vector<8x384xf32>
    %10 = arith.truncf %9 : vector<8x384xf32> to vector<8x384xbf16>
    %cst = arith.constant dense<0.000000e+00> : vector<8x384xf32>
    %11 = tpu.matmul %3, %7, %cst {dimension_numbers = #tpu.dot_dimension_numbers<[1], [0], [0], [1], [0, 0, 1, 1], [], []>} : vector<8x8xbf16>, vector<8x384xbf16>, vector<8x384xf32> -> vector<8x384xf32>
    %cst_4 = arith.constant dense<0.000000e+00> : vector<8x384xf32>
    %12 = tpu.matmul %3, %10, %cst_4 {dimension_numbers = #tpu.dot_dimension_numbers<[1], [0], [0], [1], [0, 0, 1, 1], [], []>} : vector<8x8xbf16>, vector<8x384xbf16>, vector<8x384xf32> -> vector<8x384xf32>
    %13 = arith.addf %11, %12 : vector<8x384xf32>
    %cst_5 = arith.constant dense<0.000000e+00> : vector<8x384xf32>
    %14 = tpu.matmul %6, %7, %cst_5 {dimension_numbers = #tpu.dot_dimension_numbers<[1], [0], [0], [1], [0, 0, 1, 1], [], []>} : vector<8x8xbf16>, vector<8x384xbf16>, vector<8x384xf32> -> vector<8x384xf32>
    %15 = arith.addf %13, %14 : vector<8x384xf32>
    %c0_6 = arith.constant 0 : index
    %c0_7 = arith.constant 0 : index
    %c0_8 = arith.constant 0 : index
    %16 = vector.load %arg3[%c0_6, %c0_7, %c0_8] : memref<1x8x384xf32, #tpu.memory_space<vmem>>, vector<1x8x384xf32>
    %17 = vector.shape_cast %16 : vector<1x8x384xf32> to vector<8x384xf32>
    %18 = vector.shape_cast %15 : vector<8x384xf32> to vector<1x8x384xf32>
    tpu.vector_store %arg3[%c0_6, %c0_7, %c0_8], %18 {strides = array<i32>} : memref<1x8x384xf32, #tpu.memory_space<vmem>>, vector<1x8x384xf32>,
    %19 = tpu.iota {dimensions = array<i32: 1>} : vector<1x384xi32>
    %c324_i32 = arith.constant 324 : i32
    %20 = vector.broadcast %c324_i32 : i32 to vector<1x384xi32>
    %21 = arith.cmpi slt, %19, %20 : vector<1x384xi32>
    %22 = arith.extui %21 : vector<1x384xi1> to vector<1x384xi32>
    %23 = arith.sitofp %22 : vector<1x384xi32> to vector<1x384xf32>
    %24 = vector.broadcast %23 : vector<1x384xf32> to vector<8x384xf32>
    %25 = arith.mulf %15, %24 : vector<8x384xf32>
    %cst_9 = arith.constant dense<0.000000e+00> : vector<8xf32>
    %26 = vector.multi_reduction <add>, %25, %cst_9 [1] : vector<8x384xf32> to vector<8xf32>
    %27 = vector.shape_cast %26 : vector<8xf32> to vector<8x1xf32>
    %cst_10 = arith.constant 0.00308641978 : f32
    %28 = vector.broadcast %cst_10 : f32 to vector<8x1xf32>
    %29 = arith.mulf %27, %28 : vector<8x1xf32>
    %30 = vector.broadcast %29 : vector<8x1xf32> to vector<8x384xf32>
    %31 = arith.subf %15, %30 : vector<8x384xf32>
    %32 = arith.mulf %31, %31 : vector<8x384xf32>
    %33 = vector.broadcast %23 : vector<1x384xf32> to vector<8x384xf32>
    %34 = arith.mulf %33, %32 : vector<8x384xf32>
    %cst_11 = arith.constant dense<0.000000e+00> : vector<8xf32>
    %35 = vector.multi_reduction <add>, %34, %cst_11 [1] : vector<8x384xf32> to vector<8xf32>
    %36 = vector.shape_cast %35 : vector<8xf32> to vector<8x1xf32>
    %37 = vector.shape_cast %27 : vector<8x1xf32> to vector<8x1xf32>
    %38 = vector.broadcast %37 : vector<8x1xf32> to vector<8x128xf32>
    %39 = vector.shape_cast %36 : vector<8x1xf32> to vector<8x1xf32>
    %40 = vector.broadcast %39 : vector<8x1xf32> to vector<8x128xf32>
    %41 = tpu.concatenate %38, %40 in 1 : vector<8x128xf32>, vector<8x128xf32> -> vector<8x256xf32>
    %c0_12 = arith.constant 0 : index
    %c0_13 = arith.constant 0 : index
    %c0_14 = arith.constant 0 : index
    %42 = vector.load %arg4[%c0_12, %c0_13, %c0_14] : memref<1x8x256xf32, #tpu.memory_space<vmem>>, vector<1x8x256xf32>
    %43 = vector.shape_cast %42 : vector<1x8x256xf32> to vector<8x256xf32>
    %44 = vector.shape_cast %41 : vector<8x256xf32> to vector<1x8x256xf32>
    tpu.vector_store %arg4[%c0_12, %c0_13, %c0_14], %44 {strides = array<i32>} : memref<1x8x256xf32, #tpu.memory_space<vmem>>, vector<1x8x256xf32>,
    return
  }
  func.func @transform_0(%arg0: i32) -> (i32, i32, i32) {
    %c0_i32 = arith.constant 0 : i32
    %c0_i32_0 = arith.constant 0 : i32
    %c0_i32_1 = arith.constant 0 : i32
    return %arg0, %c0_i32, %c0_i32_0 : i32, i32, i32
  }
  func.func @transform_1(%arg0: i32) -> (i32, i32) {
    %c0_i32 = arith.constant 0 : i32
    %c0_i32_0 = arith.constant 0 : i32
    %c0_i32_1 = arith.constant 0 : i32
    return %c0_i32, %c0_i32_0 : i32, i32
  }
  func.func @transform_2(%arg0: i32) -> (i32, i32, i32) {
    %c0_i32 = arith.constant 0 : i32
    %c0_i32_0 = arith.constant 0 : i32
    %c0_i32_1 = arith.constant 0 : i32
    return %arg0, %c0_i32, %c0_i32_0 : i32, i32, i32
  }
  func.func @transform_3(%arg0: i32) -> (i32, i32, i32) {
    %c0_i32 = arith.constant 0 : i32
    %c0_i32_0 = arith.constant 0 : i32
    %c0_i32_1 = arith.constant 0 : i32
    return %arg0, %c0_i32, %c0_i32_0 : i32, i32, i32
  }
}

module attributes {stable_mosaic.version = 11 : i64} {
  func.func @conv2_kernel(%arg0: i32, %arg1: memref<1x8x384xf32, #tpu.memory_space<vmem>>, %arg2: memref<8x72xf32, #tpu.memory_space<vmem>>, %arg3: memref<8x1xf32, #tpu.memory_space<vmem>>, %arg4: memref<1x8x288xf32, #tpu.memory_space<vmem>>, %arg5: memref<1x8x256xf32, #tpu.memory_space<vmem>>) attributes {dimension_semantics = [#tpu.dimension_semantics<parallel>], iteration_bounds = array<i64: 2>, scalar_prefetch = 0 : i64, scratch_operands = 0 : i64, tpu.core_type = #tpu.core_type<tc>, window_params = [{transform_indices = @transform_0, window_bounds = array<i64: 1, 8, 384>}, {pipeline_mode = #tpu.pipeline_mode<synchronous>, transform_indices = @transform_1, window_bounds = array<i64: 8, 72>}, {pipeline_mode = #tpu.pipeline_mode<synchronous>, transform_indices = @transform_2, window_bounds = array<i64: 8, 1>}, {transform_indices = @transform_3, window_bounds = array<i64: 1, 8, 288>}, {transform_indices = @transform_4, window_bounds = array<i64: 1, 8, 256>}]} {
    %c0 = arith.constant 0 : index
    %c0_0 = arith.constant 0 : index
    %c0_1 = arith.constant 0 : index
    %0 = vector.load %arg1[%c0, %c0_0, %c0_1] : memref<1x8x384xf32, #tpu.memory_space<vmem>>, vector<1x8x384xf32>
    %1 = vector.shape_cast %0 : vector<1x8x384xf32> to vector<8x384xf32>
    %c0_2 = arith.constant 0 : index
    %c0_3 = arith.constant 0 : index
    %2 = vector.load %arg3[%c0_2, %c0_3] : memref<8x1xf32, #tpu.memory_space<vmem>>, vector<8x1xf32>
    %3 = vector.broadcast %2 : vector<8x1xf32> to vector<8x384xf32>
    %4 = arith.mulf %1, %3 : vector<8x384xf32>
    %5 = vector.extract_strided_slice %4 {offsets = [0, 0], sizes = [8, 288], strides = [1, 1]} : vector<8x384xf32> to vector<8x288xf32>
    %6 = vector.extract_strided_slice %4 {offsets = [0, 1], sizes = [8, 288], strides = [1, 1]} : vector<8x384xf32> to vector<8x288xf32>
    %7 = vector.extract_strided_slice %4 {offsets = [0, 2], sizes = [8, 288], strides = [1, 1]} : vector<8x384xf32> to vector<8x288xf32>
    %8 = vector.extract_strided_slice %4 {offsets = [0, 18], sizes = [8, 288], strides = [1, 1]} : vector<8x384xf32> to vector<8x288xf32>
    %9 = vector.extract_strided_slice %4 {offsets = [0, 19], sizes = [8, 288], strides = [1, 1]} : vector<8x384xf32> to vector<8x288xf32>
    %10 = vector.extract_strided_slice %4 {offsets = [0, 20], sizes = [8, 288], strides = [1, 1]} : vector<8x384xf32> to vector<8x288xf32>
    %11 = vector.extract_strided_slice %4 {offsets = [0, 36], sizes = [8, 288], strides = [1, 1]} : vector<8x384xf32> to vector<8x288xf32>
    %12 = vector.extract_strided_slice %4 {offsets = [0, 37], sizes = [8, 288], strides = [1, 1]} : vector<8x384xf32> to vector<8x288xf32>
    %13 = vector.extract_strided_slice %4 {offsets = [0, 38], sizes = [8, 288], strides = [1, 1]} : vector<8x384xf32> to vector<8x288xf32>
    %14 = tpu.concatenate %5, %6, %7, %8, %9, %10, %11, %12, %13 in 0 : vector<8x288xf32>, vector<8x288xf32>, vector<8x288xf32>, vector<8x288xf32>, vector<8x288xf32>, vector<8x288xf32>, vector<8x288xf32>, vector<8x288xf32>, vector<8x288xf32> -> vector<72x288xf32>
    %c0_4 = arith.constant 0 : index
    %c0_5 = arith.constant 0 : index
    %15 = vector.load %arg2[%c0_4, %c0_5] : memref<8x72xf32, #tpu.memory_space<vmem>>, vector<8x72xf32>
    %16 = arith.truncf %15 : vector<8x72xf32> to vector<8x72xbf16>
    %17 = arith.extf %16 : vector<8x72xbf16> to vector<8x72xf32>
    %18 = arith.subf %15, %17 : vector<8x72xf32>
    %19 = arith.truncf %18 : vector<8x72xf32> to vector<8x72xbf16>
    %20 = arith.truncf %14 : vector<72x288xf32> to vector<72x288xbf16>
    %21 = arith.extf %20 : vector<72x288xbf16> to vector<72x288xf32>
    %22 = arith.subf %14, %21 : vector<72x288xf32>
    %23 = arith.truncf %22 : vector<72x288xf32> to vector<72x288xbf16>
    %cst = arith.constant dense<0.000000e+00> : vector<8x288xf32>
    %24 = tpu.matmul %16, %20, %cst {dimension_numbers = #tpu.dot_dimension_numbers<[1], [0], [0], [1], [0, 0, 1, 1], [], []>} : vector<8x72xbf16>, vector<72x288xbf16>, vector<8x288xf32> -> vector<8x288xf32>
    %cst_6 = arith.constant dense<0.000000e+00> : vector<8x288xf32>
    %25 = tpu.matmul %16, %23, %cst_6 {dimension_numbers = #tpu.dot_dimension_numbers<[1], [0], [0], [1], [0, 0, 1, 1], [], []>} : vector<8x72xbf16>, vector<72x288xbf16>, vector<8x288xf32> -> vector<8x288xf32>
    %26 = arith.addf %24, %25 : vector<8x288xf32>
    %cst_7 = arith.constant dense<0.000000e+00> : vector<8x288xf32>
    %27 = tpu.matmul %19, %20, %cst_7 {dimension_numbers = #tpu.dot_dimension_numbers<[1], [0], [0], [1], [0, 0, 1, 1], [], []>} : vector<8x72xbf16>, vector<72x288xbf16>, vector<8x288xf32> -> vector<8x288xf32>
    %28 = arith.addf %26, %27 : vector<8x288xf32>
    %c0_8 = arith.constant 0 : index
    %c0_9 = arith.constant 0 : index
    %c0_10 = arith.constant 0 : index
    %29 = vector.load %arg4[%c0_8, %c0_9, %c0_10] : memref<1x8x288xf32, #tpu.memory_space<vmem>>, vector<1x8x288xf32>
    %30 = vector.shape_cast %29 : vector<1x8x288xf32> to vector<8x288xf32>
    %31 = vector.shape_cast %28 : vector<8x288xf32> to vector<1x8x288xf32>
    tpu.vector_store %arg4[%c0_8, %c0_9, %c0_10], %31 {strides = array<i32>} : memref<1x8x288xf32, #tpu.memory_space<vmem>>, vector<1x8x288xf32>,
    %32 = tpu.iota {dimensions = array<i32: 1>} : vector<1x288xi32>
    %c18_i32 = arith.constant 18 : i32
    %c0_i32 = arith.constant 0 : i32
    %33 = arith.cmpi eq, %c18_i32, %c0_i32 : i32
    %c1_i32 = arith.constant 1 : i32
    %34 = arith.select %33, %c1_i32, %c18_i32 : i32
    %35 = vector.broadcast %34 : i32 to vector<1x288xi32>
    %36 = arith.remsi %32, %35 : vector<1x288xi32>
    %c0_i32_11 = arith.constant 0 : i32
    %37 = vector.broadcast %c0_i32_11 : i32 to vector<1x288xi32>
    %38 = arith.cmpi ne, %36, %37 : vector<1x288xi32>
    %c0_i32_12 = arith.constant 0 : i32
    %39 = vector.broadcast %c0_i32_12 : i32 to vector<1x288xi32>
    %40 = arith.cmpi slt, %36, %39 : vector<1x288xi32>
    %c0_i32_13 = arith.constant 0 : i32
    %41 = arith.cmpi slt, %34, %c0_i32_13 : i32
    %42 = vector.broadcast %41 : i1 to vector<1x288xi1>
    %43 = vector.broadcast %42 : vector<1x288xi1> to vector<1x288xi1>
    %44 = arith.xori %40, %43 : vector<1x288xi1>
    %45 = arith.andi %44, %38 : vector<1x288xi1>
    %46 = vector.broadcast %34 : i32 to vector<1x288xi32>
    %47 = arith.addi %36, %46 : vector<1x288xi32>
    %48 = arith.select %45, %47, %36 : vector<1x288xi1>, vector<1x288xi32>
    %c16_i32 = arith.constant 16 : i32
    %49 = vector.broadcast %c16_i32 : i32 to vector<1x288xi32>
    %50 = arith.cmpi slt, %48, %49 : vector<1x288xi32>
    %51 = arith.extui %50 : vector<1x288xi1> to vector<1x288xi32>
    %52 = arith.sitofp %51 : vector<1x288xi32> to vector<1x288xf32>
    %53 = vector.broadcast %52 : vector<1x288xf32> to vector<8x288xf32>
    %54 = arith.mulf %28, %53 : vector<8x288xf32>
    %cst_14 = arith.constant dense<0.000000e+00> : vector<8xf32>
    %55 = vector.multi_reduction <add>, %54, %cst_14 [1] : vector<8x288xf32> to vector<8xf32>
    %56 = vector.shape_cast %55 : vector<8xf32> to vector<8x1xf32>
    %cst_15 = arith.constant 3.906250e-03 : f32
    %57 = vector.broadcast %cst_15 : f32 to vector<8x1xf32>
    %58 = arith.mulf %56, %57 : vector<8x1xf32>
    %59 = vector.broadcast %58 : vector<8x1xf32> to vector<8x288xf32>
    %60 = arith.subf %28, %59 : vector<8x288xf32>
    %61 = arith.mulf %60, %60 : vector<8x288xf32>
    %62 = vector.broadcast %52 : vector<1x288xf32> to vector<8x288xf32>
    %63 = arith.mulf %62, %61 : vector<8x288xf32>
    %cst_16 = arith.constant dense<0.000000e+00> : vector<8xf32>
    %64 = vector.multi_reduction <add>, %63, %cst_16 [1] : vector<8x288xf32> to vector<8xf32>
    %65 = vector.shape_cast %64 : vector<8xf32> to vector<8x1xf32>
    %66 = vector.shape_cast %56 : vector<8x1xf32> to vector<8x1xf32>
    %67 = vector.broadcast %66 : vector<8x1xf32> to vector<8x128xf32>
    %68 = vector.shape_cast %65 : vector<8x1xf32> to vector<8x1xf32>
    %69 = vector.broadcast %68 : vector<8x1xf32> to vector<8x128xf32>
    %70 = tpu.concatenate %67, %69 in 1 : vector<8x128xf32>, vector<8x128xf32> -> vector<8x256xf32>
    %c0_17 = arith.constant 0 : index
    %c0_18 = arith.constant 0 : index
    %c0_19 = arith.constant 0 : index
    %71 = vector.load %arg5[%c0_17, %c0_18, %c0_19] : memref<1x8x256xf32, #tpu.memory_space<vmem>>, vector<1x8x256xf32>
    %72 = vector.shape_cast %71 : vector<1x8x256xf32> to vector<8x256xf32>
    %73 = vector.shape_cast %70 : vector<8x256xf32> to vector<1x8x256xf32>
    tpu.vector_store %arg5[%c0_17, %c0_18, %c0_19], %73 {strides = array<i32>} : memref<1x8x256xf32, #tpu.memory_space<vmem>>, vector<1x8x256xf32>,
    return
  }
  func.func @transform_0(%arg0: i32) -> (i32, i32, i32) {
    %c0_i32 = arith.constant 0 : i32
    %c0_i32_0 = arith.constant 0 : i32
    %c0_i32_1 = arith.constant 0 : i32
    return %arg0, %c0_i32, %c0_i32_0 : i32, i32, i32
  }
  func.func @transform_1(%arg0: i32) -> (i32, i32) {
    %c0_i32 = arith.constant 0 : i32
    %c0_i32_0 = arith.constant 0 : i32
    %c0_i32_1 = arith.constant 0 : i32
    return %c0_i32, %c0_i32_0 : i32, i32
  }
  func.func @transform_2(%arg0: i32) -> (i32, i32) {
    %c0_i32 = arith.constant 0 : i32
    %c0_i32_0 = arith.constant 0 : i32
    %c0_i32_1 = arith.constant 0 : i32
    return %c0_i32, %c0_i32_0 : i32, i32
  }
  func.func @transform_3(%arg0: i32) -> (i32, i32, i32) {
    %c0_i32 = arith.constant 0 : i32
    %c0_i32_0 = arith.constant 0 : i32
    %c0_i32_1 = arith.constant 0 : i32
    return %arg0, %c0_i32, %c0_i32_0 : i32, i32, i32
  }
  func.func @transform_4(%arg0: i32) -> (i32, i32, i32) {
    %c0_i32 = arith.constant 0 : i32
    %c0_i32_0 = arith.constant 0 : i32
    %c0_i32_1 = arith.constant 0 : i32
    return %arg0, %c0_i32, %c0_i32_0 : i32, i32, i32
  }
}

</mosaic_0001>

<bundles_post_ra>
// kernel: residual_block_forward.5
= control target key start
LH: loop header
LB: loop body
LE: loop exit
PB: predicated region body
PF: predicated region fallthrough
CT: control target
= control target key end

     0   :  { %s374_s15 = smov 0   ;;  %s400_s0 = inlined_call_operand.vmem [shape: f32[2,8,288], index: 0, kind: input, shape index: {}]   ;;  %s401_s1 = inlined_call_operand.vmem [shape: f32[2,8,288], index: 1, kind: input, shape index: {}]   ;;  %s402_s2 = inlined_call_operand.vmem [shape: f32[8,1], index: 2, kind: input, shape index: {}]   ;;  %s403_s3 = inlined_call_operand.vmem [shape: f32[8,1], index: 3, kind: input, shape index: {}]   ;;  %s404_s4 = inlined_call_operand.vmem [shape: f32[2,8,288], index: 4, kind: output, shape index: {}]  }
   0x1 LB: > { %s319_s16 = sadd.s32 4294967295, %s346_s15   ;;  %p323_p0 = scmp.ge.s32.totalorder %s346_s15, 1  ;;  %s346_s15 = sphi %s374_s15, %s14_s15  }
   0x2   : > { %p172_p1 = scmp.lt.s32.totalorder %s346_s15, 3 }
   0x4   : > { %p173_p2 = pnand %p323_p0, %p172_p1 }
   0x5   : > { %v221_v0 = vld [vmem:[%s402_s2] sm:$0xff] (!%p173_p2)  ;;  %v348_v1 = vmov (!%p173_p2), 0   ;;  %p203_p3 = scmp.lt.s32.totalorder (!%p173_p2), %s319_s16, 1  ;;  %vm250_vm0 = vcmask (!%p173_p2), 261120  }
   0x6   : > { %176 = sbr.rel (%p173_p2) target bundleno = 147 (0x93), region = 36  ;;  %339 = vset.pattern.permute.xlu0 (!%p173_p2), %v348_v1  ;;  %v230_v2 = vld [vmem:[%s403_s3] sm:$0xff] (!%p173_p2) }
   0x7   : > { %224 = vperm.xlu0 (!%p173_p2), %339, %v221_v0  }
   0xb   : > { %233 = vperm.xlu0 (!%p173_p2), %339, %v230_v2  }
   0xd   : > { %s406_s16 = smov (!%p203_p3, %s319_s16), 1 }
   0xe   : > { %s329_s21 = smul.u32 24, %s406_s16 }
  0x10   : > { %s207_s24 = scalar_lea.vmem %s400_s0, %s329_s21  ;;  %s212_s27 = scalar_lea.vmem %s401_s1, %s329_s21 }
  0x11   : > { %v218_v4 = vld [vmem:[%s207_s24] sm:$0xff]  ;;  %v219_v5 = vld [vmem:[%s207_s24 + $0x8] sm:$0xff]  ;;  %v220_v6 = vld [vmem:[%s207_s24 + $0x10] sm:$0xff]  ;;  %s217_s30 = scalar_lea.vmem %s404_s4, %s329_s21 }
  0x12   : > { %v239_v11 = vld [vmem:[%s212_s27] sm:$0xff]  ;;  %v240_v12 = vld [vmem:[%s212_s27 + $0x8] sm:$0xff]  ;;  %v241_v13 = vld [vmem:[%s212_s27 + $0x10] sm:$0xff] }
  0x86   : > { %v225_v3 = vpop.permute.xlu0 %224 }
  0x87   : > { %v227_v7 = vmul.f32 %v225_v3, %v218_v4  ;;  %v228_v8 = vmul.f32 %v225_v3, %v219_v5  ;;  %v229_v9 = vmul.f32 %v225_v3, %v220_v6 }
  0x8a   : > { %v234_v10 = vpop.permute.xlu0 %233 }
  0x8b   : > { %v236_v14 = vadd.f32 %v234_v10, %v227_v7  ;;  %v237_v15 = vadd.f32 %v234_v10, %v228_v8  ;;  %v238_v16 = vadd.f32 %v234_v10, %v229_v9 }
  0x8d   : > { %v242_v17 = vadd.f32 %v239_v11, %v236_v14  ;;  %v243_v18 = vadd.f32 %v240_v12, %v237_v15  ;;  %v244_v19 = vadd.f32 %v241_v13, %v238_v16 }
  0x8f   : > { %v245_v20 = vmax.f32 %v242_v17, 0.0  ;;  %v246_v21 = vmax.f32 %v243_v18, 0.0  ;;  %v247_v22 = vmax.f32 %v244_v19, 0.0 }
  0x91   : > { %248 = vst [vmem:[%s217_s30] sm:$0xff] %v245_v20  ;;  %249 = vst [vmem:[%s217_s30 + $0x8] sm:$0xff] %v246_v21 }
  0x92   : > { %251 = vst.msk [vmem:[%s217_s30 + $0x10] sm:$0xff] %vm250_vm0, %v247_v22 }
  0x93 PF: > { %s14_s15 = sadd.s32 1, %s346_s15  }
  0x94   : > { %p11_p4 = scmp.ge.s32.totalorder %s14_s15, 4  }
  0x96   :  { %13 = sbr.rel (!%p11_p4) target bundleno = 1 (0x1), region = 69 }

// kernel: residual_block_forward.4
= control target key start
LH: loop header
LB: loop body
LE: loop exit
PB: predicated region body
PF: predicated region fallthrough
CT: control target
= control target key end

     0   :  { %s1033_s15 = smov 0   ;;  %s1212_s0 = inlined_call_operand.vmem [shape: f32[2,8,384], index: 0, kind: input, shape index: {}]   ;;  %s1213_s1 = inlined_call_operand.vmem [shape: f32[8,72], index: 1, kind: input, shape index: {}]   ;;  %s1214_s2 = inlined_call_operand.vmem [shape: f32[8,1], index: 2, kind: input, shape index: {}]   ;;  %s1215_s3 = inlined_call_operand.vmem [shape: f32[2,8,288], index: 3, kind: output, shape index: {0}]   ;;  %s1216_s4 = inlined_call_operand.vmem [shape: f32[2,8,256], index: 4, kind: output, shape index: {1}]  }
   0x1 LB: > { %s862_s16 = sadd.s32 4294967295, %s995_s15   ;;  %p866_p0 = scmp.ge.s32.totalorder %s995_s15, 1  ;;  %s995_s15 = sphi %s1033_s15, %s15_s15  }
   0x2   : > { %p165_p1 = scmp.lt.s32.totalorder %s995_s15, 3 }
   0x4   : > { %p166_p2 = pnand %p866_p0, %p165_p1 }
   0x5   : > { %v215_v0 = vld [vmem:[%s1214_s2] sm:$0xff] (!%p166_p2)  ;;  %v997_v1 = vmov (!%p166_p2), 0   ;;  %p196_p3 = scmp.lt.s32.totalorder (!%p166_p2), %s862_s16, 1  ;;  %v998_v2 = vmov (!%p166_p2), 0.0   ;;  %s999_s23 = smov (!%p166_p2), 127   ;;  %vm1007_vm0 = vmmov (!%p166_p2), 0  }
   0x6   : > { %169 = sbr.rel (%p166_p2) target bundleno = 865 (0x361), region = 32  ;;  %988 = vset.pattern.permute.xlu0 (!%p166_p2), %v997_v1  ;;  %458 = vmatprep.mubr.bf16.mxu0 (!%p166_p2), %v997_v1  ;;  %s1000_s24 = smov (!%p166_p2), 126   ;;  %vm233_vm1 = vcmask (!%p166_p2), 1039360   ;;  %vm245_vm2 = vcmask (!%p166_p2), 1031168   ;;  %vm257_vm3 = vcmask (!%p166_p2), 900096   ;;  %vm269_vm4 = vcmask (!%p166_p2), 891904  }
   0x7   : > { %218 = vperm.xlu0 (!%p166_p2), %988, %v215_v0   ;;  %904 = vmatprep.subr.bf16.mxu1 (!%p166_p2), %v998_v2  ;;  %s1001_s25 = smov (!%p166_p2), 110   ;;  %s1002_s26 = smov (!%p166_p2), 109   ;;  %vm281_vm5 = vcmask (!%p166_p2), 883712   ;;  %vm293_vm6 = vcmask (!%p166_p2), 752640   ;;  %vm305_vm7 = vcmask (!%p166_p2), 744448   ;;  %vm317_vm8 = vcmask (!%p166_p2), 736256  }
   0x8   : > { %s1003_s27 = smov (!%p166_p2), 108   ;;  %s1004_s28 = smov (!%p166_p2), 92   ;;  %914 = vmatprep.mubr.msk.bf16.mxu1 (!%p166_p2), %vm1007_vm0, %v998_v2  ;;  %vm416_vm9 = vcmask (!%p166_p2), 1043456   ;;  %vm412_vm10 = vcmask (!%p166_p2), 588800  }
   0x9   : > { %s1005_s29 = smov (!%p166_p2), 91   ;;  %s1006_s30 = smov (!%p166_p2), 90  }
   0xd   : > { %s1218_s16 = smov (!%p196_p3, %s862_s16), 1 }
   0xe   : > { %s962_s19 = smul.u32 24, %s1218_s16  ;;  %s885_s10 = sshll.u32 %s1218_s16, 4 }
   0xf   : > { %s210_s13 = scalar_lea.vmem %s1216_s4, %s885_s10 }
  0x10   : > { %s200_s22 = scalar_lea.vmem %s1212_s0, %s962_s19  ;;  %s205_s9 = scalar_lea.vmem %s1215_s3, %s962_s19 }
  0x11   : > { %v213_v3 = vld [vmem:[%s200_s22 + $0x8] sm:$0xff]  ;;  %v214_v4 = vld [vmem:[%s200_s22 + $0x10] sm:$0xff]  ;;  %v212_v8 = vld [vmem:[%s200_s22] sm:$0xff] }
  0x86   : > { %v219_v5 = vpop.permute.xlu0 %218 }
  0x87   : > { %v222_v6 = vmul.f32 %v219_v5, %v213_v3  ;;  %v223_v7 = vmul.f32 %v219_v5, %v214_v4  ;;  %v221_v9 = vmul.f32 %v219_v5, %v212_v8 }
  0x89   : > { %231 = vrot.lane.b32.xlu1 %v223_v7, %s999_s23  ;;  %229 = vrot.lane.b32.xlu0 %v222_v6, %s999_s23 }
  0x8d   : > { %241 = vrot.lane.b32.xlu0 %v222_v6, %s1000_s24  ;;  %227 = vrot.lane.b32.xlu1 %v221_v9, %s999_s23 }
  0x91   : > { %253 = vrot.lane.b32.xlu0 %v222_v6, %s1001_s25  ;;  %243 = vrot.lane.b32.xlu1 %v223_v7, %s1000_s24 }
  0x95   : > { %239 = vrot.lane.b32.xlu0 %v221_v9, %s1000_s24  ;;  %255 = vrot.lane.b32.xlu1 %v223_v7, %s1001_s25 }
  0x99   : > { %265 = vrot.lane.b32.xlu0 %v222_v6, %s1002_s26  ;;  %251 = vrot.lane.b32.xlu1 %v221_v9, %s1001_s25 }
  0x9d   : > { %277 = vrot.lane.b32.xlu0 %v222_v6, %s1003_s27  ;;  %267 = vrot.lane.b32.xlu1 %v223_v7, %s1002_s26 }
  0xa1   : > { %263 = vrot.lane.b32.xlu0 %v221_v9, %s1002_s26  ;;  %279 = vrot.lane.b32.xlu1 %v223_v7, %s1003_s27 }
  0xa5   : > { %289 = vrot.lane.b32.xlu0 %v222_v6, %s1004_s28  ;;  %275 = vrot.lane.b32.xlu1 %v221_v9, %s1003_s27 }
  0xa9   : > { %301 = vrot.lane.b32.xlu0 %v222_v6, %s1005_s29  ;;  %291 = vrot.lane.b32.xlu1 %v223_v7, %s1004_s28 }
  0xad   : > { %287 = vrot.lane.b32.xlu0 %v221_v9, %s1004_s28  ;;  %303 = vrot.lane.b32.xlu1 %v223_v7, %s1005_s29 }
  0xb1   : > { %311 = vrot.lane.b32.xlu0 %v221_v9, %s1006_s30  ;;  %299 = vrot.lane.b32.xlu1 %v221_v9, %s1005_s29 }
  0xb5   : > { %315 = vrot.lane.b32.xlu0 %v223_v7, %s1006_s30  ;;  %313 = vrot.lane.b32.xlu1 %v222_v6, %s1006_s30 }
  0xfb   : > { %v232_v10 = vpop.permute.xlu1 %231  ;;  %v230_v11 = vpop.permute.xlu0 %229 }
  0xfc   : > { %v1057_v12 = vpack.c.bf16 %v232_v10, %v223_v7  ;;  %v235_v13 = vsel %vm233_vm1, %v230_v11, %v232_v10 }
  0xfd   : > { %v1059_v14 = vpack.c.bf16 %v235_v13, %v222_v6 }
  0xfe   : > { %v345_v15 = vunpack.c.l.bf16 %v1057_v12  ;;  %v348_v16 = vunpack.c.h.bf16 %v1057_v12 }
  0xff   : > { %v242_v17 = vpop.permute.xlu0 %241  ;;  %v228_v18 = vpop.permute.xlu1 %227  ;;  %v344_v19 = vunpack.c.l.bf16 %v1059_v14  ;;  %v347_v20 = vunpack.c.h.bf16 %v1059_v14 }
 0x100   : > { %v234_v21 = vsel %vm233_vm1, %v228_v18, %v230_v11  ;;  %v372_v22 = vsub.f32 %v223_v7, %v345_v15  ;;  %v375_v23 = vsub.f32 %v232_v10, %v348_v16 }
 0x101   : > { %v1065_v24 = vpack.c.bf16 %v234_v21, %v221_v9  ;;  %v371_v25 = vsub.f32 %v222_v6, %v344_v19  ;;  %v374_v26 = vsub.f32 %v235_v13, %v347_v20 }
 0x102   : > { %v399_v27 = vpack.c.bf16 %v375_v23, %v372_v22 }
 0x103   : > { %v346_v28 = vunpack.c.h.bf16 %v1065_v24  ;;  %v254_v29 = vpop.permute.xlu0 %253  ;;  %v244_v30 = vpop.permute.xlu1 %243  ;;  %v398_v31 = vpack.c.bf16 %v374_v26, %v371_v25  ;;  %v343_v32 = vunpack.c.l.bf16 %v1065_v24 }
 0x104   : > { %905 = vmatpush3.bf16.msra.mxu1 %v399_v27  ;;  %v247_v38 = vsel %vm245_vm2, %v242_v17, %v244_v30 }
 0x105   : > { %v373_v33 = vsub.f32 %v234_v21, %v346_v28  ;;  %426 = vmatprep.subr.bf16.mxu0 %v398_v31  ;;  %v370_v34 = vsub.f32 %v221_v9, %v343_v32  ;;  %906 = vmatprep.subr.bf16.mxu1 %v998_v2 }
 0x107   : > { %v240_v35 = vpop.permute.xlu0 %239  ;;  %v256_v36 = vpop.permute.xlu1 %255  ;;  %v397_v37 = vpack.c.bf16 %v373_v33, %v370_v34 }
 0x108   : > { %v259_v39 = vsel %vm257_vm3, %v254_v29, %v256_v36  ;;  %v1072_v40 = vpack.c.bf16 %v256_v36, %v244_v30  ;;  %v246_v48 = vsel %vm245_vm2, %v240_v35, %v242_v17 }
 0x109   : > { %v1074_v41 = vpack.c.bf16 %v259_v39, %v247_v38  ;;  %427 = vmatpush1.bf16.msra.mxu0 %v397_v37 }
 0x10a   : > { %v354_v42 = vunpack.c.h.bf16 %v1072_v40  ;;  %v351_v43 = vunpack.c.l.bf16 %v1072_v40 }
 0x10b   : > { %v353_v44 = vunpack.c.h.bf16 %v1074_v41  ;;  %v266_v45 = vpop.permute.xlu0 %265  ;;  %v252_v46 = vpop.permute.xlu1 %251  ;;  %v350_v47 = vunpack.c.l.bf16 %v1074_v41 }
 0x10c   : > { %v381_v49 = vsub.f32 %v256_v36, %v354_v42  ;;  %v258_v50 = vsel %vm257_vm3, %v252_v46, %v254_v29  ;;  %v378_v51 = vsub.f32 %v244_v30, %v351_v43 }
 0x10d   : > { %v380_v52 = vsub.f32 %v259_v39, %v353_v44  ;;  %v1082_v53 = vpack.c.bf16 %v258_v50, %v246_v48  ;;  %v377_v54 = vsub.f32 %v247_v38, %v350_v47 }
 0x10e   : > { %v402_v55 = vpack.c.bf16 %v381_v49, %v378_v51 }
 0x10f   : > { %v352_v56 = vunpack.c.h.bf16 %v1082_v53  ;;  %v278_v57 = vpop.permute.xlu0 %277  ;;  %v268_v58 = vpop.permute.xlu1 %267  ;;  %v401_v59 = vpack.c.bf16 %v380_v52, %v377_v54  ;;  %v349_v60 = vunpack.c.l.bf16 %v1082_v53 }
 0x110   : > { %907 = vmatpush3.bf16.msra.mxu1 %v402_v55  ;;  %v271_v4 = vsel %vm269_vm4, %v266_v45, %v268_v58 }
 0x111   : > { %v379_v61 = vsub.f32 %v258_v50, %v352_v56  ;;  %428 = vmatprep.subr.bf16.mxu0 %v401_v59  ;;  %v376_v62 = vsub.f32 %v246_v48, %v349_v60  ;;  %908 = vmatprep.subr.bf16.mxu1 %v998_v2 }
 0x113   : > { %v264_v63 = vpop.permute.xlu0 %263  ;;  %v280_v0 = vpop.permute.xlu1 %279  ;;  %v400_v3 = vpack.c.bf16 %v379_v61, %v376_v62 }
 0x114   : > { %v283_v5 = vsel %vm281_vm5, %v278_v57, %v280_v0  ;;  %v1089_v6 = vpack.c.bf16 %v280_v0, %v268_v58  ;;  %v270_v16 = vsel %vm269_vm4, %v264_v63, %v266_v45 }
 0x115   : > { %v1091_v7 = vpack.c.bf16 %v283_v5, %v271_v4  ;;  %429 = vmatpush1.bf16.msra.mxu0 %v400_v3 }
 0x116   : > { %v360_v8 = vunpack.c.h.bf16 %v1089_v6  ;;  %v357_v9 = vunpack.c.l.bf16 %v1089_v6 }
 0x117   : > { %v359_v10 = vunpack.c.h.bf16 %v1091_v7  ;;  %v290_v11 = vpop.permute.xlu0 %289  ;;  %v276_v13 = vpop.permute.xlu1 %275  ;;  %v356_v15 = vunpack.c.l.bf16 %v1091_v7 }
 0x118   : > { %v387_v17 = vsub.f32 %v280_v0, %v360_v8  ;;  %v282_v18 = vsel %vm281_vm5, %v276_v13, %v278_v57  ;;  %v384_v19 = vsub.f32 %v268_v58, %v357_v9 }
 0x119   : > { %v386_v20 = vsub.f32 %v283_v5, %v359_v10  ;;  %v1099_v21 = vpack.c.bf16 %v282_v18, %v270_v16  ;;  %v383_v22 = vsub.f32 %v271_v4, %v356_v15 }
 0x11a   : > { %v405_v23 = vpack.c.bf16 %v387_v17, %v384_v19  ;;  %v323_v17 = vld [vmem:[%s1213_s1] sm:$0xff] }
 0x11b   : > { %v358_v25 = vunpack.c.h.bf16 %v1099_v21  ;;  %v302_v26 = vpop.permute.xlu0 %301  ;;  %v292_v27 = vpop.permute.xlu1 %291  ;;  %v404_v28 = vpack.c.bf16 %v386_v20, %v383_v22  ;;  %v355_v29 = vunpack.c.l.bf16 %v1099_v21 }
 0x11c   : > { %909 = vmatpush3.bf16.msra.mxu1 %v405_v23  ;;  %v295_v35 = vsel %vm293_vm6, %v290_v11, %v292_v27  ;;  %v324_v23 = vpack.c.bf16 %v323_v17, %v323_v17 }
 0x11d   : > { %v385_v30 = vsub.f32 %v282_v18, %v358_v25  ;;  %430 = vmatprep.subr.bf16.mxu0 %v404_v28  ;;  %v382_v31 = vsub.f32 %v270_v16, %v355_v29  ;;  %910 = vmatprep.subr.bf16.mxu1 %v998_v2 }
 0x11f   : > { %v288_v32 = vpop.permute.xlu0 %287  ;;  %v304_v33 = vpop.permute.xlu1 %303  ;;  %v403_v34 = vpack.c.bf16 %v385_v30, %v382_v31 }
 0x120   : > { %v307_v36 = vsel %vm305_vm7, %v302_v26, %v304_v33  ;;  %v1106_v37 = vpack.c.bf16 %v304_v33, %v292_v27  ;;  %v294_v47 = vsel %vm293_vm6, %v288_v32, %v290_v11 }
 0x121   : > { %v1108_v38 = vpack.c.bf16 %v307_v36, %v295_v35  ;;  %431 = vmatpush1.bf16.msra.mxu0 %v403_v34 }
 0x122   : > { %v366_v39 = vunpack.c.h.bf16 %v1106_v37  ;;  %v363_v42 = vunpack.c.l.bf16 %v1106_v37 }
 0x123   : > { %v365_v43 = vunpack.c.h.bf16 %v1108_v38  ;;  %v312_v44 = vpop.permute.xlu0 %311  ;;  %v300_v45 = vpop.permute.xlu1 %299  ;;  %v362_v46 = vunpack.c.l.bf16 %v1108_v38 }
 0x124   : > { %v393_v48 = vsub.f32 %v304_v33, %v366_v39  ;;  %v306_v49 = vsel %vm305_vm7, %v300_v45, %v302_v26  ;;  %v390_v50 = vsub.f32 %v292_v27, %v363_v42  ;;  %vm686_vm7 = vcmask 261120  }
 0x125   : > { %v392_v51 = vsub.f32 %v307_v36, %v365_v43  ;;  %v1116_v52 = vpack.c.bf16 %v306_v49, %v294_v47  ;;  %v389_v54 = vsub.f32 %v295_v35, %v362_v46 }
 0x126   : > { %v408_v55 = vpack.c.bf16 %v393_v48, %v390_v50 }
 0x127   : > { %v364_v56 = vunpack.c.h.bf16 %v1116_v52  ;;  %v316_v57 = vpop.permute.xlu0 %315  ;;  %v314_v58 = vpop.permute.xlu1 %313  ;;  %v407_v59 = vpack.c.bf16 %v392_v51, %v389_v54  ;;  %v361_v60 = vunpack.c.l.bf16 %v1116_v52 }
 0x128   : > { %v342_v61 = vpack.c.bf16 %v316_v57, %v316_v57  ;;  %v318_v62 = vsel %vm317_vm8, %v312_v44, %v314_v58  ;;  %v319_v63 = vsel %vm317_vm8, %v314_v58, %v316_v57  ;;  %911 = vmatpush3.bf16.msra.mxu1 %v408_v55 }
 0x129   : > { %v391_v0 = vsub.f32 %v306_v49, %v364_v56  ;;  %v340_v3 = vpack.c.bf16 %v318_v62, %v318_v62  ;;  %v1120_v4 = vpack.c.bf16 %v319_v63, %v319_v63  ;;  %432 = vmatprep.subr.bf16.mxu0 %v407_v59  ;;  %v388_v5 = vsub.f32 %v294_v47, %v361_v60 }
 0x12a   : > { %v369_v8 = vunpack.c.l.bf16 %v342_v61  ;;  %912 = vmatprep.subr.bf16.mxu1 %v998_v2  ;;  %v514_v26 = vsel %vm416_vm9, %v342_v61, 0 }
 0x12b   : > { %v367_v9 = vunpack.c.l.bf16 %v340_v3  ;;  %v368_v10 = vunpack.c.l.bf16 %v1120_v4  ;;  %v406_v11 = vpack.c.bf16 %v391_v0, %v388_v5  ;;  %v508_v27 = vsel %vm416_vm9, %v340_v3, 0 }
 0x12c   : > { %v396_v13 = vsub.f32 %v316_v57, %v369_v8 }
 0x12d   : > { %v394_v15 = vsub.f32 %v318_v62, %v367_v9  ;;  %v395_v16 = vsub.f32 %v319_v63, %v368_v10  ;;  %433 = vmatpush1.bf16.msra.mxu0 %v406_v11 }
 0x12e   : > { %v411_v18 = vpack.c.bf16 %v396_v13, %v396_v13 }
 0x12f   : > { %v409_v19 = vpack.c.bf16 %v394_v15, %v394_v15  ;;  %v410_v20 = vpack.c.bf16 %v395_v16, %v395_v16 }
 0x130   : > { %v424_v22 = vsel %vm416_vm9, %v411_v18, 0 }
 0x131   : > { %871 = vmatprep.subr.msk.bf16.mxu0 %vm416_vm9, %v410_v20  ;;  %913 = vmatpush3.bf16.msra.mxu1 %v424_v22  ;;  %v418_v25 = vsel %vm416_vm9, %v409_v19, 0 }
 0x132   : > { %435 = vmatpush1.bf16.msra.mxu0 %v418_v25  ;;  %918 = vmatprep.subr.bf16.mxu1 %v998_v2 }
 0x133   : > { %516 = vmatprep.subr.bf16.mxu0 %v1059_v14 }
 0x134   : > { %915 = vmatmul.mubr.msk.bf16.vlgmr.msra.gmra.mrb[0].mxu1 %vm412_vm10, %v324_v23 }
 0x135   : > { %919 = vmatpush3.bf16.msra.mxu1 %v1057_v12  ;;  %872 = vmatmul.mubr.msk.bf16.vlgmr.msra.gmra.mrb[0].mxu0 %vm412_vm10, %v324_v23 }
 0x136   : > { %517 = vmatpush1.bf16.msra.mxu0 %v1065_v24  ;;  %920 = vmatprep.subr.bf16.mxu1 %v998_v2 }
 0x137   : > { %518 = vmatprep.subr.bf16.mxu0 %v1074_v41  ;;  %928 = vmatprep.mubr.msk.bf16.mxu1 %vm1007_vm0, %v998_v2 }
 0x138   : > { %548 = vmatprep.mubr.bf16.mxu0 %v997_v1 }
 0x139   : > { %921 = vmatpush3.bf16.msra.mxu1 %v1072_v40 }
 0x13a   : > { %519 = vmatpush1.bf16.msra.mxu0 %v1082_v53  ;;  %922 = vmatprep.subr.bf16.mxu1 %v998_v2 }
 0x13b   : > { %520 = vmatprep.subr.bf16.mxu0 %v1091_v7 }
 0x13d   : > { %923 = vmatpush3.bf16.msra.mxu1 %v1089_v6 }
 0x13e   : > { %521 = vmatpush1.bf16.msra.mxu0 %v1099_v21  ;;  %924 = vmatprep.subr.bf16.mxu1 %v998_v2 }
 0x13f   : > { %522 = vmatprep.subr.bf16.mxu0 %v1108_v38 }
 0x141   : > { %925 = vmatpush3.bf16.msra.mxu1 %v1106_v37 }
 0x142   : > { %523 = vmatpush1.bf16.msra.mxu0 %v1116_v52  ;;  %926 = vmatprep.subr.bf16.mxu1 %v998_v2 }
 0x143   : > { %874 = vmatprep.subr.msk.bf16.mxu0 %vm416_vm9, %v1120_v4 }
 0x145   : > { %927 = vmatpush3.bf16.msra.mxu1 %v514_v26 }
 0x146   : > { %525 = vmatpush1.bf16.msra.mxu0 %v508_v27  ;;  %932 = vmatprep.subr.bf16.mxu1 %v998_v2 }
 0x147   : > { %600 = vmatprep.subr.bf16.mxu0 %v1059_v14 }
 0x148   : > { %929 = vmatmul.mubr.msk.bf16.vlgmr.msra.gmra.mrb[0].mxu1 %vm412_vm10, %v324_v23 }
 0x149   : > { %933 = vmatpush3.bf16.msra.mxu1 %v1057_v12  ;;  %875 = vmatmul.mubr.msk.bf16.vlgmr.msra.gmra.mrb[0].mxu0 %vm412_vm10, %v324_v23  ;;  %v325_v12 = vunpack.c.l.bf16 %v324_v23 }
 0x14a   : > { %601 = vmatpush1.bf16.msra.mxu0 %v1065_v24  ;;  %934 = vmatprep.subr.bf16.mxu1 %v998_v2  ;;  %v688_v24 = vlaneseq }
 0x14b   : > { %602 = vmatprep.subr.bf16.mxu0 %v1074_v41  ;;  %942 = vmatprep.mubr.msk.bf16.mxu1 %vm1007_vm0, %v998_v2  ;;  %v326_v14 = vsub.f32 %v323_v17, %v325_v12 }
 0x14c   : > { %632 = vmatprep.mubr.bf16.mxu0 %v997_v1 }
 0x14d   : > { %935 = vmatpush3.bf16.msra.mxu1 %v1072_v40  ;;  %v327_v1 = vpack.c.bf16 %v326_v14, %v326_v14  ;;  %v689_v40 = vand.u32 127, %v688_v24 }
 0x14e   : > { %603 = vmatpush1.bf16.msra.mxu0 %v1082_v53  ;;  %936 = vmatprep.subr.bf16.mxu1 %v998_v2 }
 0x14f   : > { %604 = vmatprep.subr.bf16.mxu0 %v1091_v7  ;;  %v691_v41 = vadd.s32 256, %v689_v40  ;;  %v690_v53 = vadd.s32 128, %v689_v40 }
 0x151   : > { %937 = vmatpush3.bf16.msra.mxu1 %v1089_v6  ;;  %v1182_v6 = vmul.u32.u64.low 3817748708, %v691_v41  ;;  %v1183_v7 = vmul.u32.u64.high 3817748708, %v691_v41, %v1182_v6  ;;  %v1188_v29 = vmul.u32.u64.low 3817748708, %v690_v53  ;;  %v1189_v30 = vmul.u32.u64.high 3817748708, %v690_v53, %v1188_v29 }
 0x152   : > { %605 = vmatpush1.bf16.msra.mxu0 %v1099_v21  ;;  %938 = vmatprep.subr.bf16.mxu1 %v998_v2  ;;  %v1185_v21 = vmul.u32.u64.low 3817748708, %v689_v40  ;;  %v1186_v28 = vmul.u32.u64.high 3817748708, %v689_v40, %v1185_v21 }
 0x153   : > { %606 = vmatprep.subr.bf16.mxu0 %v1108_v38  ;;  %v720_v31 = vshrl.u32 %v1183_v7, 4  ;;  %v709_v33 = vshrl.u32 %v1189_v30, 4 }
 0x154   : > { %v698_v32 = vshrl.u32 %v1186_v28, 4 }
 0x155   : > { %939 = vmatpush3.bf16.msra.mxu1 %v1106_v37  ;;  %v721_v34 = vmul.u32 18, %v720_v31  ;;  %v710_v36 = vmul.u32 18, %v709_v33 }
 0x156   : > { %607 = vmatpush1.bf16.msra.mxu0 %v1116_v52  ;;  %940 = vmatprep.subr.bf16.mxu1 %v998_v2  ;;  %v699_v35 = vmul.u32 18, %v698_v32 }
 0x157   : > { %877 = vmatprep.subr.msk.bf16.mxu0 %vm416_vm9, %v1120_v4  ;;  %v722_v37 = vsub.s32 %v691_v41, %v721_v34  ;;  %v711_v39 = vsub.s32 %v690_v53, %v710_v36 }
 0x158   : > { %v700_v38 = vsub.s32 %v689_v40, %v699_v35 }
 0x159   : > { %941 = vmatpush3.bf16.msra.mxu1 %v514_v26  ;;  %vm727_vm11 = vcmp.ne.s32.totalorder %v722_v37, 0  ;;  %vm730_vm12 = vcmp.lt.s32.totalorder %v722_v37, 0  ;;  %vm726_vm15 = vcmp.ne.s32.totalorder %v711_v39, 0  ;;  %vm729_vm0 = vcmp.lt.s32.totalorder %v711_v39, 0 }
 0x15a   : > { %609 = vmatpush1.bf16.msra.mxu0 %v508_v27  ;;  %vm725_vm13 = vcmp.ne.s32.totalorder %v700_v38, 0  ;;  %vm728_vm14 = vcmp.lt.s32.totalorder %v700_v38, 0  ;;  %vm733_vm1 = vmand %vm730_vm12, %vm727_vm11  ;;  %v736_v42 = vadd.s32 18, %v722_v37  ;;  %v734_v43 = vadd.s32 18, %v700_v38 }
 0x15b   : > { %vm731_vm2 = vmand %vm728_vm14, %vm725_vm13  ;;  %v735_v44 = vadd.s32 18, %v711_v39 }
 0x15c   : > { %943 = vmatmul.mubr.msk.bf16.vlgmr.msra.gmra.mrb[0].mxu1 %vm412_vm10, %v327_v1  ;;  %vm732_vm3 = vmand %vm729_vm0, %vm726_vm15  ;;  %v739_v45 = vsel %vm733_vm1, %v736_v42, %v722_v37  ;;  %v737_v46 = vsel %vm731_vm2, %v734_v43, %v700_v38 }
 0x15d   : > { %878 = vmatmul.mubr.msk.bf16.vlgmr.msra.gmra.mrb[0].mxu0 %vm412_vm10, %v327_v1  ;;  %v738_v47 = vsel %vm732_vm3, %v735_v44, %v711_v39  ;;  %vm742_vm4 = vcmp.lt.s32.totalorder %v739_v45, 16  ;;  %vm740_vm5 = vcmp.lt.s32.totalorder %v737_v46, 16 }
 0x15e   : > { %vm741_vm6 = vcmp.lt.s32.totalorder %v738_v47, 16  ;;  %v882_v48 = vsel %vm742_vm4, 1.0, %v998_v2  ;;  %v880_v49 = vsel %vm740_vm5, 1.0, %v998_v2 }
 0x15f   : > { %v881_v51 = vsel %vm741_vm6, 1.0, %v998_v2 }
 0x22f   : > { %v675_v50 = vpop.f32.mrb[0].mxu1 }
 0x230   : > { %687 = vst.msk [vmem:[%s205_s9 + $0x10] sm:$0xff] %vm686_vm7, %v675_v50  ;;  %v634_v52 = vpop.f32.mrb[0].mxu0  ;;  %v944_v54 = vpop.f32.mrb[1].mxu1  ;;  %v751_v55 = vmul.f32 %v882_v48, %v675_v50 }
 0x231   : > { %684 = vst [vmem:[%s205_s9] sm:$0xff] %v634_v52  ;;  %v749_v56 = vmul.f32 %v880_v49, %v634_v52  ;;  %v636_v57 = vpop.f32.mrb[1].mxu0  ;;  %v678_v58 = vpop.f32.mrb[2].mxu1 }
 0x232   : > { %685 = vst [vmem:[%s205_s9 + $0x8] sm:$0xff] %v636_v57  ;;  %v750_v59 = vmul.f32 %v881_v51, %v636_v57  ;;  %v638_v60 = vpop.f32.mrb[2].mxu0  ;;  %v945_v61 = vpop.f32.mrb[3].mxu1  ;;  %v753_v0 = vsel %vm686_vm7, %v751_v55, 0.0 }
 0x233   : > { %v639_v62 = vpop.f32.mrb[3].mxu0 }
 0x234   : > { %v752_v63 = vadd.f32 %v750_v59, %v749_v56 }
 0x236   : > { %v754_v3 = vadd.f32 %v753_v0, %v752_v63 }
 0x238   : > { %755 = vadd.xlane.f32.xlu1 %v754_v3 }
 0x2c5   : > { %v756_v2 = vpop.xlane.xlu1 %755 }
 0x2c6   : > { %v757_v4 = vmul.f32 0.00390625, %v756_v2  ;;  %772 = vst [vmem:[%s210_s13] sm:$0xff] %v756_v2 }
 0x2c8   : > { %v758_v5 = vsub.f32 %v634_v52, %v757_v4  ;;  %v759_v8 = vsub.f32 %v636_v57, %v757_v4  ;;  %v760_v9 = vsub.f32 %v675_v50, %v757_v4 }
 0x2ca   : > { %v761_v10 = vmul.f32 %v758_v5, %v758_v5  ;;  %v762_v11 = vmul.f32 %v759_v8, %v759_v8  ;;  %v763_v13 = vmul.f32 %v760_v9, %v760_v9 }
 0x2cc   : > { %v764_v15 = vmul.f32 %v880_v49, %v761_v10  ;;  %v765_v16 = vmul.f32 %v881_v51, %v762_v11  ;;  %v766_v17 = vmul.f32 %v882_v48, %v763_v13 }
 0x2ce   : > { %v767_v18 = vadd.f32 %v765_v16, %v764_v15  ;;  %v768_v19 = vsel %vm686_vm7, %v766_v17, 0.0 }
 0x2d0   : > { %v769_v20 = vadd.f32 %v768_v19, %v767_v18 }
 0x2d2   : > { %770 = vadd.xlane.f32.xlu0 %v769_v20 }
 0x35f   : > { %v771_v22 = vpop.xlane.xlu0 %770 }
 0x360   : > { %773 = vst [vmem:[%s210_s13 + $0x8] sm:$0xff] %v771_v22 }
 0x361 PF: > { %s15_s15 = sadd.s32 1, %s995_s15  }
 0x362   : > { %p12_p4 = scmp.ge.s32.totalorder %s15_s15, 4  }
 0x364   :  { %14 = sbr.rel (!%p12_p4) target bundleno = 1 (0x1), region = 74 }

// kernel: residual_block_forward.3
= control target key start
LH: loop header
LB: loop body
LE: loop exit
PB: predicated region body
PF: predicated region fallthrough
CT: control target
= control target key end

     0   :  { %s709_s12 = smov 0   ;;  %s756_s0 = inlined_call_operand.vmem [shape: f32[2,8,384], index: 0, kind: input, shape index: {}]   ;;  %s757_s1 = inlined_call_operand.vmem [shape: f32[8,8], index: 1, kind: input, shape index: {}]   ;;  %s758_s2 = inlined_call_operand.vmem [shape: f32[2,8,384], index: 2, kind: output, shape index: {0}]   ;;  %s759_s3 = inlined_call_operand.vmem [shape: f32[2,8,256], index: 3, kind: output, shape index: {1}]  }
   0x1 LB: > { %s604_s13 = sadd.s32 4294967295, %s684_s12   ;;  %p608_p0 = scmp.ge.s32.totalorder %s684_s12, 1  ;;  %s684_s12 = sphi %s709_s12, %s14_s12  }
   0x2   : > { %p140_p1 = scmp.lt.s32.totalorder %s684_s12, 3 }
   0x4   : > { %p141_p2 = pnand %p608_p0, %p140_p1 }
   0x5   : > { %p169_p3 = scmp.lt.s32.totalorder (!%p141_p2), %s604_s13, 1  ;;  %v686_v0 = vmov (!%p141_p2), 0.0   ;;  %v687_v1 = vmov (!%p141_p2), 0   ;;  %vm688_vm0 = vmmov (!%p141_p2), 0   ;;  %vm209_vm1 = vcmask (!%p141_p2), 1043456   ;;  %v185_v14 = vld [vmem:[%s757_s1] sm:$0xff] (!%p141_p2) }
   0x6   : > { %144 = sbr.rel (%p141_p2) target bundleno = 566 (0x236), region = 28  ;;  %632 = vmatprep.subr.bf16.mxu1 (!%p141_p2), %v686_v0  ;;  %251 = vmatprep.mubr.bf16.mxu0 (!%p141_p2), %v687_v1  ;;  %v189_v20 = vpack.c.bf16 (!%p141_p2), %v185_v14, %v185_v14  ;;  %vm205_vm2 = vcmask (!%p141_p2), 64512   ;;  %v480_v26 = vlaneseq (!%p141_p2) }
   0x7   : > { %634 = vmatprep.mubr.msk.bf16.mxu1 (!%p141_p2), %vm688_vm0, %v686_v0 }
   0x8   : > { %v190_v23 = vunpack.c.l.bf16 (!%p141_p2), %v189_v20  ;;  %v481_v27 = vand.u32 (!%p141_p2), 127, %v480_v26 }
   0xa   : > { %v191_v24 = vsub.f32 (!%p141_p2), %v185_v14, %v190_v23  ;;  %v483_v28 = vadd.s32 (!%p141_p2), 256, %v481_v27 }
   0xc   : > { %v192_v25 = vpack.c.bf16 (!%p141_p2), %v191_v24, %v191_v24  ;;  %vm486_vm3 = vcmp.lt.s32.totalorder (!%p141_p2), %v483_v28, 324 }
   0xd   : > { %s761_s13 = smov (!%p169_p3, %s604_s13), 1  ;;  %v622_v29 = vsel %vm486_vm3, 1.0, %v686_v0 }
   0xe   : > { %s666_s14 = smul.u32 24, %s761_s13  ;;  %s625_s23 = sshll.u32 %s761_s13, 4 }
   0xf   : > { %s183_s26 = scalar_lea.vmem %s759_s3, %s625_s23 }
  0x10   : > { %s173_s17 = scalar_lea.vmem %s756_s0, %s666_s14  ;;  %s178_s22 = scalar_lea.vmem %s758_s2, %s666_s14 }
  0x11   : > { %v187_v2 = vld [vmem:[%s173_s17 + $0x8] sm:$0xff]  ;;  %v186_v3 = vld [vmem:[%s173_s17] sm:$0xff]  ;;  %v188_v4 = vld [vmem:[%s173_s17 + $0x10] sm:$0xff] }
  0x12   : > { %v194_v5 = vpack.c.bf16 %v187_v2, %v187_v2  ;;  %v193_v6 = vpack.c.bf16 %v186_v3, %v186_v3  ;;  %v195_v7 = vpack.c.bf16 %v188_v4, %v188_v4 }
  0x14   : > { %v197_v8 = vunpack.c.l.bf16 %v194_v5  ;;  %v196_v9 = vunpack.c.l.bf16 %v193_v6  ;;  %v198_v10 = vunpack.c.l.bf16 %v195_v7  ;;  %v301_v21 = vsel %vm209_vm1, %v193_v6, 0 }
  0x15   : > { %v307_v22 = vsel %vm209_vm1, %v195_v7, 0 }
  0x16   : > { %v200_v11 = vsub.f32 %v187_v2, %v197_v8  ;;  %v199_v12 = vsub.f32 %v186_v3, %v196_v9  ;;  %v201_v13 = vsub.f32 %v188_v4, %v198_v10 }
  0x18   : > { %v203_v15 = vpack.c.bf16 %v200_v11, %v200_v11  ;;  %v202_v16 = vpack.c.bf16 %v199_v12, %v199_v12  ;;  %v204_v17 = vpack.c.bf16 %v201_v13, %v201_v13 }
  0x1a   : > { %613 = vmatprep.subr.msk.bf16.mxu0 %vm209_vm1, %v203_v15  ;;  %v211_v18 = vsel %vm209_vm1, %v202_v16, 0  ;;  %v217_v19 = vsel %vm209_vm1, %v204_v17, 0 }
  0x1b   : > { %220 = vmatpush1.bf16.msra.mxu0 %v211_v18  ;;  %633 = vmatpush3.bf16.msra.mxu1 %v217_v19 }
  0x1c   : > { %616 = vmatprep.subr.msk.bf16.mxu0 %vm209_vm1, %v194_v5  ;;  %638 = vmatprep.subr.bf16.mxu1 %v686_v0 }
  0x1e   : > { %614 = vmatmul.mubr.msk.bf16.vlgmr.msra.gmra.mrb[0].mxu0 %vm205_vm2, %v189_v20  ;;  %635 = vmatmul.mubr.msk.bf16.vlgmr.msra.gmra.mrb[0].mxu1 %vm205_vm2, %v189_v20 }
  0x1f   : > { %310 = vmatpush1.bf16.msra.mxu0 %v301_v21  ;;  %639 = vmatpush3.bf16.msra.mxu1 %v307_v22 }
  0x20   : > { %341 = vmatprep.mubr.bf16.mxu0 %v687_v1  ;;  %640 = vmatprep.mubr.msk.bf16.mxu1 %vm688_vm0, %v686_v0 }
  0x21   : > { %619 = vmatprep.subr.msk.bf16.mxu0 %vm209_vm1, %v194_v5  ;;  %644 = vmatprep.subr.bf16.mxu1 %v686_v0 }
  0x2a   : > { %617 = vmatmul.mubr.msk.bf16.vlgmr.msra.gmra.mrb[0].mxu0 %vm205_vm2, %v189_v20  ;;  %641 = vmatmul.mubr.msk.bf16.vlgmr.msra.gmra.mrb[0].mxu1 %vm205_vm2, %v189_v20 }
  0x2b   : > { %394 = vmatpush1.bf16.msra.mxu0 %v301_v21  ;;  %645 = vmatpush3.bf16.msra.mxu1 %v307_v22 }
  0x2c   : > { %425 = vmatprep.mubr.bf16.mxu0 %v687_v1  ;;  %646 = vmatprep.mubr.msk.bf16.mxu1 %vm688_vm0, %v686_v0 }
  0x36   : > { %620 = vmatmul.mubr.msk.bf16.vlgmr.msra.gmra.mrb[0].mxu0 %vm205_vm2, %v192_v25  ;;  %647 = vmatmul.mubr.msk.bf16.vlgmr.msra.gmra.mrb[0].mxu1 %vm205_vm2, %v192_v25 }
 0x109   : > { %v427_v30 = vpop.f32.mrb[0].mxu0  ;;  %v468_v31 = vpop.f32.mrb[0].mxu1 }
 0x10a   : > { %477 = vst [vmem:[%s178_s22] sm:$0xff] %v427_v30  ;;  %479 = vst [vmem:[%s178_s22 + $0x10] sm:$0xff] %v468_v31  ;;  %v429_v32 = vpop.f32.mrb[1].mxu0  ;;  %v648_v33 = vpop.f32.mrb[1].mxu1  ;;  %v495_v34 = vmul.f32 %v622_v29, %v468_v31 }
 0x10b   : > { %478 = vst [vmem:[%s178_s22 + $0x8] sm:$0xff] %v429_v32  ;;  %v431_v35 = vpop.f32.mrb[2].mxu0  ;;  %v471_v36 = vpop.f32.mrb[2].mxu1  ;;  %v496_v37 = vadd.f32 %v429_v32, %v427_v30 }
 0x10c   : > { %v432_v38 = vpop.f32.mrb[3].mxu0  ;;  %v649_v39 = vpop.f32.mrb[3].mxu1 }
 0x10d   : > { %v497_v40 = vadd.f32 %v496_v37, %v495_v34 }
 0x10f   : > { %498 = vadd.xlane.f32.xlu0 %v497_v40 }
 0x19c   : > { %v499_v41 = vpop.xlane.xlu0 %498 }
 0x19d   : > { %v500_v42 = vmul.f32 0.0030864198, %v499_v41  ;;  %514 = vst [vmem:[%s183_s26] sm:$0xff] %v499_v41 }
 0x19f   : > { %v501_v43 = vsub.f32 %v427_v30, %v500_v42  ;;  %v502_v44 = vsub.f32 %v429_v32, %v500_v42  ;;  %v503_v45 = vsub.f32 %v468_v31, %v500_v42 }
 0x1a1   : > { %v504_v46 = vmul.f32 %v501_v43, %v501_v43  ;;  %v505_v47 = vmul.f32 %v502_v44, %v502_v44  ;;  %v506_v48 = vmul.f32 %v503_v45, %v503_v45 }
 0x1a3   : > { %v509_v49 = vmul.f32 %v622_v29, %v506_v48  ;;  %v510_v50 = vadd.f32 %v505_v47, %v504_v46 }
 0x1a5   : > { %v511_v51 = vadd.f32 %v510_v50, %v509_v49 }
 0x1a7   : > { %512 = vadd.xlane.f32.xlu0 %v511_v51 }
 0x234   : > { %v513_v52 = vpop.xlane.xlu0 %512 }
 0x235   : > { %515 = vst [vmem:[%s183_s26 + $0x8] sm:$0xff] %v513_v52 }
 0x236 PF: > { %s14_s12 = sadd.s32 1, %s684_s12  }
 0x237   : > { %p11_p4 = scmp.ge.s32.totalorder %s14_s12, 4  }
 0x239   :  { %13 = sbr.rel (!%p11_p4) target bundleno = 1 (0x1), region = 70 }

</bundles_post_ra>
